<compile_context>
chip_gen: v7x
topology: tpu7x:2x2x1
jax: 0.10.0
libtpu: 0.0.40
codegen_flags: <defaults>
</compile_context>

<pallas_src>
import functools

import numpy as np
import jax
import jax.numpy as jnp
from jax.experimental import pallas as pl
from jax.experimental.pallas import tpu as pltpu  # noqa: F401  (TPU backend)


# ----------------------------------------------------------------------------
# Parameter setup (glue): cosine beta schedule -> gamma table, deterministic.
# ----------------------------------------------------------------------------
def cosine_beta_schedule(timesteps: int, s: float = 0.008,
                         raise_to_power: float = 1.0) -> np.ndarray:
    """DiGress diffusion_utils.cosine_beta_schedule. Returns alphas_cumprod of
    length timesteps + 1."""
    steps = timesteps + 2
    x = np.linspace(0, steps, steps)
    alphas_cumprod = np.cos(((x / steps) + s) / (1 + s) * np.pi * 0.5) ** 2
    alphas_cumprod = alphas_cumprod / alphas_cumprod[0]
    betas = 1.0 - (alphas_cumprod[1:] / alphas_cumprod[:-1])
    betas = np.clip(betas, a_min=0.0, a_max=0.999)
    alphas = 1.0 - betas
    alphas_cumprod = np.cumprod(alphas, axis=0)
    if raise_to_power != 1.0:
        alphas_cumprod = np.power(alphas_cumprod, raise_to_power)
    return alphas_cumprod


def make_gamma_table(timesteps: int) -> np.ndarray:
    """Replicates PredefinedNoiseSchedule.__init__ with noise_schedule='cosine'.
    Returns gamma of length timesteps + 1 (float32)."""
    alphas2 = cosine_beta_schedule(timesteps)          # (T+1,)
    sigmas2 = 1.0 - alphas2
    log_alphas2 = np.log(alphas2)
    log_sigmas2 = np.log(sigmas2)
    log_alphas2_to_sigmas2 = log_alphas2 - log_sigmas2
    gamma = (-log_alphas2_to_sigmas2).astype(np.float32)  # (T+1,)
    return gamma


def pad_gamma_to_lanes(gamma: np.ndarray, lane: int = 128) -> np.ndarray:
    """Pad the table length up to a multiple of 128 lanes (501 -> 512).
    Pad value is irrelevant (indices are clamped to <= timesteps); use edge."""
    n = gamma.shape[0]
    pad = (-n) % lane
    if pad:
        gamma = np.concatenate(
            [gamma, np.full((pad,), gamma[-1], dtype=gamma.dtype)])
    return gamma


# ----------------------------------------------------------------------------
# Pallas kernel: t_int = clamp(round(t*T), 0, T); out[0,b] = gamma[t_int[b]].
# Layout: t, out lane-dense (1, B); gamma as a (TABLE_PAD, 1) sublane column.
# One-hot gather = sublane-iota compare (VPU) + masked select + sublane reduce.
# ----------------------------------------------------------------------------
def _gamma_lookup_kernel(t_ref, gamma_ref, out_ref, *, timesteps: int):
    t = t_ref[...]                                   # (1, B) float32
    gamma_col = gamma_ref[...]                       # (TABLE_PAD, 1) float32
    table_pad = gamma_col.shape[0]
    b = t.shape[1]

    # round-half-to-even (matches torch.round), then clamp for robustness.
    t_int = jnp.round(t * jnp.float32(timesteps)).astype(jnp.int32)   # (1, B)
    t_int = jnp.clip(t_int, 0, timesteps)                             # (1, B)

    # One-hot over the table axis (sublanes) for every batch lane.
    sub_iota = jax.lax.broadcasted_iota(jnp.int32, (table_pad, b), 0)  # (TP, B)
    onehot = (sub_iota == t_int)                                       # (TP, B)
    picked = jnp.where(onehot, gamma_col, jnp.float32(0.0))            # (TP, B)
    out_ref[...] = jnp.sum(picked, axis=0, keepdims=True)              # (1, B)


def predefined_noise_schedule_forward(t: jax.Array,
                                      gamma_table_padded: jax.Array,
                                      timesteps: int) -> jax.Array:
    """t: (B, 1) (or (B,)) float32 normalized time in [0, 1];
    gamma_table_padded: (TABLE_PAD,) float32, TABLE_PAD % 128 == 0.
    Returns (B, 1) float32 = gamma[round(t * timesteps)]."""
    B = t.shape[0]
    table_pad = gamma_table_padded.shape[0]

    t_row = t.reshape(1, B).astype(jnp.float32)            # lane-dense input
    gamma_col = gamma_table_padded.reshape(table_pad, 1)   # sublane column

    out_row = pl.pallas_call(
        functools.partial(_gamma_lookup_kernel, timesteps=timesteps),
        out_shape=jax.ShapeDtypeStruct((1, B), jnp.float32),
        in_specs=[
            pl.BlockSpec((1, B), lambda: (0, 0)),
            pl.BlockSpec((table_pad, 1), lambda: (0, 0)),
        ],
        out_specs=pl.BlockSpec((1, B), lambda: (0, 0)),
        # Tiny, honest cost hint so XLA does not treat this as a heavyweight
        # custom call and serialize neighbors around it.
        cost_estimate=pl.CostEstimate(
            flops=3 * B * table_pad,
            transcendentals=0,
            bytes_accessed=table_pad * 4 + 2 * B * 4,
        ),
    )(t_row, gamma_col)

    return out_row.reshape(B, 1)                            # lane-dense -> (B,1)


if __name__ == "__main__":
    timesteps = 500     # DiGress default diffusion_steps
    B = 8               # small batch of normalized times

    gamma_np = make_gamma_table(timesteps)                  # (501,)
    gamma_pad_np = pad_gamma_to_lanes(gamma_np)             # (512,)
    gamma_table = jnp.asarray(gamma_np, dtype=jnp.float32)
    gamma_table_padded = jnp.asarray(gamma_pad_np, dtype=jnp.float32)

    key = jax.random.PRNGKey(0)
    t_int_ref = jax.random.randint(key, (B, 1), 0, timesteps + 1)
    t = t_int_ref.astype(jnp.float32) / jnp.float32(timesteps)
    # Exercise the endpoints explicitly (t = 0 and t = 1).
    t = t.at[0, 0].set(0.0).at[B - 1, 0].set(1.0)

    out = predefined_noise_schedule_forward(t, gamma_table_padded, timesteps)
    out = jax.block_until_ready(out)

    # Pure-JAX reference (same semantics as the PyTorch forward, with clamp).
    t_int = jnp.clip(jnp.round(t * timesteps).astype(jnp.int32), 0, timesteps)
    ref = gamma_table[t_int[:, 0]].reshape(B, 1)
    np.testing.assert_allclose(np.asarray(out), np.asarray(ref),
                               rtol=1e-6, atol=1e-6)

    print("KERNEL_OK")
</pallas_src>

<mosaic_0001>
module attributes {stable_mosaic.version = 11 : i64} {
  func.func @_gamma_lookup_kernel(%arg0: memref<1x8xf32, #tpu.memory_space<vmem>>, %arg1: memref<512x1xf32, #tpu.memory_space<vmem>>, %arg2: memref<1x8xf32, #tpu.memory_space<vmem>>) attributes {dimension_semantics = [], scalar_prefetch = 0 : i64, scratch_operands = 0 : i64, tpu.core_type = #tpu.core_type<tc>} {
    %c0 = arith.constant 0 : index
    %c0_0 = arith.constant 0 : index
    %0 = vector.load %arg0[%c0, %c0_0] : memref<1x8xf32, #tpu.memory_space<vmem>>, vector<1x8xf32>
    %c0_1 = arith.constant 0 : index
    %c0_2 = arith.constant 0 : index
    %1 = vector.load %arg1[%c0_1, %c0_2] : memref<512x1xf32, #tpu.memory_space<vmem>>, vector<512x1xf32>
    %cst = arith.constant 5.000000e+02 : f32
    %2 = vector.broadcast %cst : f32 to vector<1x8xf32>
    %3 = arith.mulf %0, %2 : vector<1x8xf32>
    %4 = math.roundeven %3 : vector<1x8xf32>
    %5 = arith.fptosi %4 : vector<1x8xf32> to vector<1x8xi32>
    %c0_i32 = arith.constant 0 : i32
    %c500_i32 = arith.constant 500 : i32
    %6 = vector.broadcast %c0_i32 : i32 to vector<1x8xi32>
    %7 = arith.maxsi %6, %5 : vector<1x8xi32>
    %8 = vector.broadcast %c500_i32 : i32 to vector<1x8xi32>
    %9 = arith.minsi %8, %7 : vector<1x8xi32>
    %10 = tpu.iota {dimensions = array<i32: 0>} : vector<512x8xi32>
    %11 = vector.broadcast %9 : vector<1x8xi32> to vector<512x8xi32>
    %12 = arith.cmpi eq, %10, %11 : vector<512x8xi32>
    %cst_3 = arith.constant 0.000000e+00 : f32
    %13 = vector.shape_cast %1 : vector<512x1xf32> to vector<512x1xf32>
    %14 = vector.broadcast %13 : vector<512x1xf32> to vector<512x8xf32>
    %15 = vector.broadcast %cst_3 : f32 to vector<512x8xf32>
    %16 = arith.select %12, %14, %15 : vector<512x8xi1>, vector<512x8xf32>
    %cst_4 = arith.constant dense<0.000000e+00> : vector<8xf32>
    %17 = vector.multi_reduction <add>, %16, %cst_4 [0] : vector<512x8xf32> to vector<8xf32>
    %18 = vector.shape_cast %17 : vector<8xf32> to vector<1x8xf32>
    %c0_5 = arith.constant 0 : index
    %c0_6 = arith.constant 0 : index
    %19 = vector.load %arg2[%c0_5, %c0_6] : memref<1x8xf32, #tpu.memory_space<vmem>>, vector<1x8xf32>
    tpu.vector_store %arg2[%c0_5, %c0_6], %18 {strides = array<i32>} : memref<1x8xf32, #tpu.memory_space<vmem>>, vector<1x8xf32>,
    return
  }
}

</mosaic_0001>

<bundles_post_ra>
// kernel: tpu_custom_call.1
= control target key start
LH: loop header
LB: loop body
LE: loop exit
PB: predicated region body
PF: predicated region fallthrough
CT: control target
= control target key end

     0   :  { %v781_v2 = vmov 0   ;;  %s1202_s0 = inlined_call_operand.vmem [shape: f32[1,8], index: 0, kind: input, shape index: {}]   ;;  %s1203_s1 = inlined_call_operand.vmem [shape: f32[512,1], index: 1, kind: input, shape index: {}]   ;;  %s1204_s2 = inlined_call_operand.hbm [shape: f32[1,8], index: 2, kind: output, shape index: {}]  }
   0x1   :  { %v15_v0 = vld [vmem:[%s1203_s1 + $0x10] sm:$0xff]  ;;  %v13_v1 = vld [vmem:[%s1203_s1] sm:$0xff]  ;;  %756 = vset.pattern.permute.xlu1 %v781_v2  ;;  %755 = vset.pattern.permute.xlu0 %v781_v2  ;;  %v16_v3 = vld [vmem:[%s1203_s1 + $0x18] sm:$0xff] }
   0x2   :  { %228 = vperm.xlu1 %756, %v15_v0   ;;  %218 = vperm.xlu0 %755, %v13_v1   ;;  %v14_v4 = vld [vmem:[%s1203_s1 + $0x8] sm:$0xff]  ;;  %v17_v6 = vld [vmem:[%s1203_s1 + $0x20] sm:$0xff]  ;;  %v20_v7 = vld [vmem:[%s1203_s1 + $0x38] sm:$0xff] }
   0x3   :  { %v18_v5 = vld [vmem:[%s1203_s1 + $0x28] sm:$0xff]  ;;  %v19_v8 = vld [vmem:[%s1203_s1 + $0x30] sm:$0xff]  ;;  %v21_v10 = vld [vmem:[%s1203_s1 + $0x40] sm:$0xff] }
   0x4   :  { %v22_v9 = vld [vmem:[%s1203_s1 + $0x48] sm:$0xff]  ;;  %v24_v11 = vld [vmem:[%s1203_s1 + $0x58] sm:$0xff]  ;;  %v23_v12 = vld [vmem:[%s1203_s1 + $0x50] sm:$0xff] }
   0x6   :  { %233 = vperm.xlu1 %756, %v16_v3   ;;  %223 = vperm.xlu0 %755, %v14_v4  }
   0xa   :  { %243 = vperm.xlu1 %756, %v18_v5   ;;  %238 = vperm.xlu0 %755, %v17_v6  }
   0xe   :  { %253 = vperm.xlu1 %756, %v20_v7   ;;  %248 = vperm.xlu0 %755, %v19_v8  }
  0x12   :  { %263 = vperm.xlu1 %756, %v22_v9   ;;  %258 = vperm.xlu0 %755, %v21_v10  }
  0x13   :  { %7 = vsyncpa [#allocation3], 0  ;;  %v26_v13 = vld [vmem:[%s1203_s1 + $0x68] sm:$0xff]  ;;  %v25_v14 = vld [vmem:[%s1203_s1 + $0x60] sm:$0xff]  ;;  %v83_v62 = vlaneseq  ;;  %vm600_vm5 = vcmask 64512  }
  0x14   :  { %v28_v15 = vld [vmem:[%s1203_s1 + $0x78] sm:$0xff]  ;;  %v27_v16 = vld [vmem:[%s1203_s1 + $0x70] sm:$0xff]  ;;  %v30_v17 = vld [vmem:[%s1203_s1 + $0x88] sm:$0xff] }
  0x15   :  { %v29_v18 = vld [vmem:[%s1203_s1 + $0x80] sm:$0xff]  ;;  %v32_v19 = vld [vmem:[%s1203_s1 + $0x98] sm:$0xff]  ;;  %v31_v20 = vld [vmem:[%s1203_s1 + $0x90] sm:$0xff]  ;;  %v981_v2 = vshrl.u32 %v83_v62, 7 }
  0x16   :  { %273 = vperm.xlu1 %756, %v24_v11   ;;  %268 = vperm.xlu0 %755, %v23_v12   ;;  %v34_v21 = vld [vmem:[%s1203_s1 + $0xa8] sm:$0xff]  ;;  %v33_v22 = vld [vmem:[%s1203_s1 + $0xa0] sm:$0xff]  ;;  %v36_v23 = vld [vmem:[%s1203_s1 + $0xb8] sm:$0xff] }
  0x17   :  { %v35_v24 = vld [vmem:[%s1203_s1 + $0xb0] sm:$0xff]  ;;  %v38_v25 = vld [vmem:[%s1203_s1 + $0xc8] sm:$0xff]  ;;  %v37_v26 = vld [vmem:[%s1203_s1 + $0xc0] sm:$0xff]  ;;  %v150_v5 = vsub.s32 0, %v981_v2  ;;  %v86_v10 = vadd.s32 16, %v981_v2  ;;  %v85_v11 = vadd.s32 8, %v981_v2 }
  0x18   :  { %v40_v27 = vld [vmem:[%s1203_s1 + $0xd8] sm:$0xff]  ;;  %v39_v28 = vld [vmem:[%s1203_s1 + $0xd0] sm:$0xff]  ;;  %v42_v29 = vld [vmem:[%s1203_s1 + $0xe8] sm:$0xff] }
  0x19   :  { %v41_v30 = vld [vmem:[%s1203_s1 + $0xe0] sm:$0xff]  ;;  %v44_v31 = vld [vmem:[%s1203_s1 + $0xf8] sm:$0xff]  ;;  %v43_v32 = vld [vmem:[%s1203_s1 + $0xf0] sm:$0xff] }
  0x1a   :  { %283 = vperm.xlu1 %756, %v26_v13   ;;  %278 = vperm.xlu0 %755, %v25_v14   ;;  %v46_v33 = vld [vmem:[%s1203_s1 + $0x108] sm:$0xff]  ;;  %v45_v34 = vld [vmem:[%s1203_s1 + $0x100] sm:$0xff]  ;;  %v48_v35 = vld [vmem:[%s1203_s1 + $0x118] sm:$0xff]  ;;  %v87_v14 = vadd.s32 24, %v981_v2 }
  0x1b   :  { %v47_v36 = vld [vmem:[%s1203_s1 + $0x110] sm:$0xff]  ;;  %v50_v37 = vld [vmem:[%s1203_s1 + $0x128] sm:$0xff]  ;;  %v49_v38 = vld [vmem:[%s1203_s1 + $0x120] sm:$0xff] }
  0x1c   :  { %v52_v39 = vld [vmem:[%s1203_s1 + $0x138] sm:$0xff]  ;;  %v51_v40 = vld [vmem:[%s1203_s1 + $0x130] sm:$0xff]  ;;  %v54_v41 = vld [vmem:[%s1203_s1 + $0x148] sm:$0xff] }
  0x1d   :  { %v53_v42 = vld [vmem:[%s1203_s1 + $0x140] sm:$0xff]  ;;  %v56_v43 = vld [vmem:[%s1203_s1 + $0x158] sm:$0xff]  ;;  %v55_v44 = vld [vmem:[%s1203_s1 + $0x150] sm:$0xff] }
  0x1e   :  { %293 = vperm.xlu1 %756, %v28_v15   ;;  %288 = vperm.xlu0 %755, %v27_v16   ;;  %v58_v45 = vld [vmem:[%s1203_s1 + $0x168] sm:$0xff]  ;;  %v57_v46 = vld [vmem:[%s1203_s1 + $0x160] sm:$0xff]  ;;  %v60_v47 = vld [vmem:[%s1203_s1 + $0x178] sm:$0xff]  ;;  %v88_v15 = vadd.s32 32, %v981_v2 }
  0x1f   :  { %v59_v48 = vld [vmem:[%s1203_s1 + $0x170] sm:$0xff]  ;;  %v62_v49 = vld [vmem:[%s1203_s1 + $0x188] sm:$0xff]  ;;  %v61_v50 = vld [vmem:[%s1203_s1 + $0x180] sm:$0xff] }
  0x20   :  { %v64_v51 = vld [vmem:[%s1203_s1 + $0x198] sm:$0xff]  ;;  %v63_v52 = vld [vmem:[%s1203_s1 + $0x190] sm:$0xff]  ;;  %v12_v53 = vld [vmem:[%s1202_s0] sm:$0x1] }
  0x21   :  { %v66_v54 = vld [vmem:[%s1203_s1 + $0x1a8] sm:$0xff]  ;;  %v65_v55 = vld [vmem:[%s1203_s1 + $0x1a0] sm:$0xff]  ;;  %v77_v56 = vmul.f32 500.0, %v12_v53  ;;  %v68_v57 = vld [vmem:[%s1203_s1 + $0x1b8] sm:$0xff] }
  0x22   :  { %303 = vperm.xlu1 %756, %v30_v17   ;;  %298 = vperm.xlu0 %755, %v29_v18   ;;  %v67_v58 = vld [vmem:[%s1203_s1 + $0x1b0] sm:$0xff]  ;;  %v70_v60 = vld [vmem:[%s1203_s1 + $0x1c8] sm:$0xff]  ;;  %v69_v61 = vld [vmem:[%s1203_s1 + $0x1c0] sm:$0xff] }
  0x23   :  { %v752_v59 = vcvt.f32.s32 %v77_v56  ;;  %v72_v63 = vld [vmem:[%s1203_s1 + $0x1d8] sm:$0xff]  ;;  %v71_v0 = vld [vmem:[%s1203_s1 + $0x1d0] sm:$0xff]  ;;  %v74_v3 = vld [vmem:[%s1203_s1 + $0x1e8] sm:$0xff] }
  0x24   :  { %v73_v4 = vld [vmem:[%s1203_s1 + $0x1e0] sm:$0xff]  ;;  %v76_v7 = vld [vmem:[%s1203_s1 + $0x1f8] sm:$0xff]  ;;  %v75_v8 = vld [vmem:[%s1203_s1 + $0x1f0] sm:$0xff]  ;;  %s782_s1 = smov [#allocation2]  }
  0x25   :  { %vm79_vm0 = vcmp.gt.s32.totalorder %v752_v59, 0  ;;  %s742_s26 = sshll.u32 %s782_s1, 4  ;;  %s743_s26 = int_to_ptr.vmem [resolvable:$true] %s742_s26 }
  0x26   :  { %313 = vperm.xlu1 %756, %v32_v19   ;;  %308 = vperm.xlu0 %755, %v31_v20   ;;  %v80_v1 = vsel %vm79_vm0, %v752_v59, 0  ;;  %v89_v19 = vadd.s32 40, %v981_v2  ;;  %s757_s27 = scalar_lea.vmem %s743_s26, 16  ;;  %s761_s28 = scalar_lea.vmem %s743_s26, 32 }
  0x27   :  { %vm81_vm1 = vcmp.lt.s32.totalorder %v80_v1, 500  ;;  %p758_p0 = scmp.ne.s32.totalorder %s743_s26, %s757_s27  ;;  %p762_p1 = scmp.lt.s32.totalorder %s743_s26, %s743_s26 }
  0x28   :  { %v82_v6 = vsel %vm81_vm1, %v80_v1, 500  ;;  %p763_p2 = scmp.lt.s32.totalorder %s761_s28, %s757_s27 }
  0x29   :  { %v996_v9 = vrot.slane %v82_v6, %v150_v5 }
  0x2a   :  { %323 = vperm.xlu1 %756, %v34_v21   ;;  %318 = vperm.xlu0 %755, %v33_v22   ;;  %p764_p3 = por %p763_p2, %p762_p1 }
  0x2b   :  { %vm152_vm2 = vcmp.eq.s32.totalorder %v981_v2, %v996_v9  ;;  %vm154_vm3 = vcmp.eq.s32.totalorder %v86_v10, %v996_v9  ;;  %vm153_vm4 = vcmp.eq.s32.totalorder %v85_v11, %v996_v9  ;;  %vm155_vm6 = vcmp.eq.s32.totalorder %v87_v14, %v996_v9 }
  0x2c   :  { %vm156_vm7 = vcmp.eq.s32.totalorder %v88_v15, %v996_v9  ;;  %vm157_vm8 = vcmp.eq.s32.totalorder %v89_v19, %v996_v9  ;;  %p765_p4 = pnand %p764_p3, %p758_p0 }
  0x2e   :  { %333 = vperm.xlu1 %756, %v36_v23   ;;  %328 = vperm.xlu0 %755, %v35_v24   ;;  %v90_v24 = vadd.s32 48, %v981_v2 }
  0x30   :  { %vm158_vm9 = vcmp.eq.s32.totalorder %v90_v24, %v996_v9 }
  0x32   :  { %343 = vperm.xlu1 %756, %v38_v25   ;;  %338 = vperm.xlu0 %755, %v37_v26  }
  0x36   :  { %353 = vperm.xlu1 %756, %v40_v27   ;;  %348 = vperm.xlu0 %755, %v39_v28  }
  0x3a   :  { %363 = vperm.xlu1 %756, %v42_v29   ;;  %358 = vperm.xlu0 %755, %v41_v30   ;;  %v91_v30 = vadd.s32 56, %v981_v2 }
  0x3c   :  { %vm159_vm10 = vcmp.eq.s32.totalorder %v91_v30, %v996_v9 }
  0x3e   :  { %373 = vperm.xlu1 %756, %v44_v31   ;;  %368 = vperm.xlu0 %755, %v43_v32  }
  0x42   :  { %383 = vperm.xlu1 %756, %v46_v33   ;;  %378 = vperm.xlu0 %755, %v45_v34   ;;  %v92_v34 = vadd.s32 64, %v981_v2 }
  0x44   :  { %vm160_vm11 = vcmp.eq.s32.totalorder %v92_v34, %v996_v9 }
  0x46   :  { %393 = vperm.xlu1 %756, %v48_v35   ;;  %388 = vperm.xlu0 %755, %v47_v36  }
  0x4a   :  { %403 = vperm.xlu1 %756, %v50_v37   ;;  %398 = vperm.xlu0 %755, %v49_v38  }
  0x4e   :  { %413 = vperm.xlu1 %756, %v52_v39   ;;  %408 = vperm.xlu0 %755, %v51_v40   ;;  %v93_v40 = vadd.s32 72, %v981_v2 }
  0x50   :  { %vm161_vm12 = vcmp.eq.s32.totalorder %v93_v40, %v996_v9 }
  0x52   :  { %423 = vperm.xlu1 %756, %v54_v41   ;;  %418 = vperm.xlu0 %755, %v53_v42  }
  0x56   :  { %433 = vperm.xlu1 %756, %v56_v43   ;;  %428 = vperm.xlu0 %755, %v55_v44   ;;  %v94_v44 = vadd.s32 80, %v981_v2 }
  0x58   :  { %vm162_vm13 = vcmp.eq.s32.totalorder %v94_v44, %v996_v9 }
  0x5a   :  { %443 = vperm.xlu1 %756, %v58_v45   ;;  %438 = vperm.xlu0 %755, %v57_v46  }
  0x5e   :  { %453 = vperm.xlu1 %756, %v60_v47   ;;  %448 = vperm.xlu0 %755, %v59_v48  }
  0x62   :  { %463 = vperm.xlu1 %756, %v62_v49   ;;  %458 = vperm.xlu0 %755, %v61_v50   ;;  %v95_v50 = vadd.s32 88, %v981_v2 }
  0x64   :  { %vm163_vm14 = vcmp.eq.s32.totalorder %v95_v50, %v996_v9 }
  0x66   :  { %473 = vperm.xlu1 %756, %v64_v51   ;;  %468 = vperm.xlu0 %755, %v63_v52  }
  0x6a   :  { %483 = vperm.xlu1 %756, %v66_v54   ;;  %478 = vperm.xlu0 %755, %v65_v55   ;;  %v96_v54 = vadd.s32 96, %v981_v2 }
  0x6c   :  { %vm164_vm15 = vcmp.eq.s32.totalorder %v96_v54, %v996_v9 }
  0x6e   :  { %493 = vperm.xlu1 %756, %v68_v57   ;;  %488 = vperm.xlu0 %755, %v67_v58  }
  0x72   :  { %503 = vperm.xlu1 %756, %v70_v60   ;;  %498 = vperm.xlu0 %755, %v69_v61   ;;  %v97_v60 = vadd.s32 104, %v981_v2 }
  0x74   :  { %vm165_vm0 = vcmp.eq.s32.totalorder %v97_v60, %v996_v9 }
  0x76   :  { %513 = vperm.xlu1 %756, %v72_v63   ;;  %508 = vperm.xlu0 %755, %v71_v0   ;;  %v98_v0 = vadd.s32 112, %v981_v2 }
  0x78   :  { %vm166_vm1 = vcmp.eq.s32.totalorder %v98_v0, %v996_v9 }
  0x7a   :  { %523 = vperm.xlu1 %756, %v74_v3   ;;  %518 = vperm.xlu0 %755, %v73_v4  }
  0x7e   :  { %533 = vperm.xlu1 %756, %v76_v7   ;;  %528 = vperm.xlu0 %755, %v75_v8   ;;  %v99_v7 = vadd.s32 120, %v981_v2 }
  0x81   :  { %v229_v12 = vpop.permute.xlu1 %228  ;;  %v219_v13 = vpop.permute.xlu0 %218 }
  0x82   :  { %v536_v16 = vsel %vm152_vm2, %v219_v13, 0.0  ;;  %v538_v20 = vsel %vm154_vm3, %v229_v12, 0.0  ;;  %v100_v12 = vadd.s32 128, %v981_v2  ;;  %vm167_vm2 = vcmp.eq.s32.totalorder %v99_v7, %v996_v9 }
  0x83   :  { %v601_v22 = vsel %vm600_vm5, %v536_v16, 0.0  ;;  %v604_v27 = vsel %vm600_vm5, %v538_v20, 0.0 }
  0x84   :  { %vm168_vm3 = vcmp.eq.s32.totalorder %v100_v12, %v996_v9 }
  0x85   :  { %v234_v17 = vpop.permute.xlu1 %233  ;;  %v224_v18 = vpop.permute.xlu0 %223 }
  0x86   :  { %v537_v21 = vsel %vm153_vm4, %v224_v18, 0.0  ;;  %v539_v25 = vsel %vm155_vm6, %v234_v17, 0.0  ;;  %v101_v18 = vadd.s32 136, %v981_v2 }
  0x87   :  { %v602_v23 = vsel %vm600_vm5, %v537_v21, 0.0  ;;  %v606_v33 = vsel %vm600_vm5, %v539_v25, 0.0 }
  0x88   :  { %v603_v26 = vadd.f32 %v602_v23, %v601_v22  ;;  %v102_v22 = vadd.s32 144, %v981_v2  ;;  %vm169_vm4 = vcmp.eq.s32.totalorder %v101_v18, %v996_v9 }
  0x89   :  { %v244_v28 = vpop.permute.xlu1 %243  ;;  %v239_v29 = vpop.permute.xlu0 %238 }
  0x8a   :  { %v605_v31 = vadd.f32 %v604_v27, %v603_v26  ;;  %v540_v32 = vsel %vm156_vm7, %v239_v29, 0.0  ;;  %v541_v36 = vsel %vm157_vm8, %v244_v28, 0.0  ;;  %v103_v28 = vadd.s32 152, %v981_v2 }
  0x8b   :  { %v608_v37 = vsel %vm600_vm5, %v540_v32, 0.0  ;;  %v610_v43 = vsel %vm600_vm5, %v541_v36, 0.0  ;;  %vm170_vm6 = vcmp.eq.s32.totalorder %v102_v22, %v996_v9  ;;  %v104_v32 = vadd.s32 160, %v981_v2 }
  0x8c   :  { %v607_v35 = vadd.f32 %v606_v33, %v605_v31  ;;  %vm171_vm7 = vcmp.eq.s32.totalorder %v103_v28, %v996_v9 }
  0x8d   :  { %v254_v38 = vpop.permute.xlu1 %253  ;;  %v249_v39 = vpop.permute.xlu0 %248  ;;  %vm172_vm8 = vcmp.eq.s32.totalorder %v104_v32, %v996_v9 }
  0x8e   :  { %v609_v41 = vadd.f32 %v608_v37, %v607_v35  ;;  %v542_v42 = vsel %vm158_vm9, %v249_v39, 0.0  ;;  %v543_v45 = vsel %vm159_vm10, %v254_v38, 0.0  ;;  %v105_v38 = vadd.s32 168, %v981_v2 }
  0x8f   :  { %v612_v47 = vsel %vm600_vm5, %v542_v42, 0.0  ;;  %v614_v53 = vsel %vm600_vm5, %v543_v45, 0.0  ;;  %v106_v42 = vadd.s32 176, %v981_v2 }
  0x90   :  { %v611_v46 = vadd.f32 %v610_v43, %v609_v41  ;;  %vm173_vm9 = vcmp.eq.s32.totalorder %v105_v38, %v996_v9 }
  0x91   :  { %v264_v48 = vpop.permute.xlu1 %263  ;;  %v259_v49 = vpop.permute.xlu0 %258  ;;  %vm174_vm10 = vcmp.eq.s32.totalorder %v106_v42, %v996_v9 }
  0x92   :  { %v613_v51 = vadd.f32 %v612_v47, %v611_v46  ;;  %v544_v52 = vsel %vm160_vm11, %v259_v49, 0.0  ;;  %v545_v55 = vsel %vm161_vm12, %v264_v48, 0.0  ;;  %v107_v48 = vadd.s32 184, %v981_v2 }
  0x93   :  { %v616_v57 = vsel %vm600_vm5, %v544_v52, 0.0  ;;  %v618_v63 = vsel %vm600_vm5, %v545_v55, 0.0  ;;  %v108_v52 = vadd.s32 192, %v981_v2 }
  0x94   :  { %v615_v56 = vadd.f32 %v614_v53, %v613_v51  ;;  %vm175_vm11 = vcmp.eq.s32.totalorder %v107_v48, %v996_v9 }
  0x95   :  { %v274_v58 = vpop.permute.xlu1 %273  ;;  %v269_v59 = vpop.permute.xlu0 %268  ;;  %vm176_vm12 = vcmp.eq.s32.totalorder %v108_v52, %v996_v9 }
  0x96   :  { %v617_v61 = vadd.f32 %v616_v57, %v615_v56  ;;  %v546_v62 = vsel %vm162_vm13, %v269_v59, 0.0  ;;  %v547_v1 = vsel %vm163_vm14, %v274_v58, 0.0  ;;  %v109_v58 = vadd.s32 200, %v981_v2 }
  0x97   :  { %v620_v4 = vsel %vm600_vm5, %v546_v62, 0.0  ;;  %v622_v11 = vsel %vm600_vm5, %v547_v1, 0.0  ;;  %v110_v62 = vadd.s32 208, %v981_v2 }
  0x98   :  { %v619_v3 = vadd.f32 %v618_v63, %v617_v61  ;;  %vm177_vm13 = vcmp.eq.s32.totalorder %v109_v58, %v996_v9 }
  0x99   :  { %v284_v5 = vpop.permute.xlu1 %283  ;;  %v279_v6 = vpop.permute.xlu0 %278  ;;  %vm178_vm14 = vcmp.eq.s32.totalorder %v110_v62, %v996_v9 }
  0x9a   :  { %v621_v8 = vadd.f32 %v620_v4, %v619_v3  ;;  %v548_v10 = vsel %vm164_vm15, %v279_v6, 0.0  ;;  %v549_v13 = vsel %vm165_vm0, %v284_v5, 0.0  ;;  %v111_v5 = vadd.s32 216, %v981_v2 }
  0x9b   :  { %v624_v15 = vsel %vm600_vm5, %v548_v10, 0.0  ;;  %v626_v21 = vsel %vm600_vm5, %v549_v13, 0.0  ;;  %v112_v10 = vadd.s32 224, %v981_v2 }
  0x9c   :  { %v623_v14 = vadd.f32 %v622_v11, %v621_v8  ;;  %vm179_vm15 = vcmp.eq.s32.totalorder %v111_v5, %v996_v9 }
  0x9d   :  { %v294_v16 = vpop.permute.xlu1 %293  ;;  %v289_v17 = vpop.permute.xlu0 %288  ;;  %vm180_vm0 = vcmp.eq.s32.totalorder %v112_v10, %v996_v9 }
  0x9e   :  { %v625_v19 = vadd.f32 %v624_v15, %v623_v14  ;;  %v550_v20 = vsel %vm166_vm1, %v289_v17, 0.0  ;;  %v551_v23 = vsel %vm167_vm2, %v294_v16, 0.0  ;;  %v113_v16 = vadd.s32 232, %v981_v2 }
  0x9f   :  { %v628_v25 = vsel %vm600_vm5, %v550_v20, 0.0  ;;  %v630_v31 = vsel %vm600_vm5, %v551_v23, 0.0  ;;  %v114_v20 = vadd.s32 240, %v981_v2 }
  0xa0   :  { %v627_v24 = vadd.f32 %v626_v21, %v625_v19  ;;  %vm181_vm1 = vcmp.eq.s32.totalorder %v113_v16, %v996_v9 }
  0xa1   :  { %v304_v26 = vpop.permute.xlu1 %303  ;;  %v299_v27 = vpop.permute.xlu0 %298  ;;  %vm182_vm2 = vcmp.eq.s32.totalorder %v114_v20, %v996_v9 }
  0xa2   :  { %v629_v29 = vadd.f32 %v628_v25, %v627_v24  ;;  %v552_v30 = vsel %vm168_vm3, %v299_v27, 0.0  ;;  %v553_v33 = vsel %vm169_vm4, %v304_v26, 0.0  ;;  %v115_v26 = vadd.s32 248, %v981_v2 }
  0xa3   :  { %v632_v35 = vsel %vm600_vm5, %v552_v30, 0.0  ;;  %v634_v41 = vsel %vm600_vm5, %v553_v33, 0.0  ;;  %v116_v30 = vadd.s32 256, %v981_v2 }
  0xa4   :  { %v631_v34 = vadd.f32 %v630_v31, %v629_v29  ;;  %vm183_vm3 = vcmp.eq.s32.totalorder %v115_v26, %v996_v9 }
  0xa5   :  { %v314_v36 = vpop.permute.xlu1 %313  ;;  %v309_v37 = vpop.permute.xlu0 %308  ;;  %vm184_vm4 = vcmp.eq.s32.totalorder %v116_v30, %v996_v9 }
  0xa6   :  { %v633_v39 = vadd.f32 %v632_v35, %v631_v34  ;;  %v554_v40 = vsel %vm170_vm6, %v309_v37, 0.0  ;;  %v555_v43 = vsel %vm171_vm7, %v314_v36, 0.0  ;;  %v117_v36 = vadd.s32 264, %v981_v2 }
  0xa7   :  { %v636_v45 = vsel %vm600_vm5, %v554_v40, 0.0  ;;  %v638_v51 = vsel %vm600_vm5, %v555_v43, 0.0  ;;  %v118_v40 = vadd.s32 272, %v981_v2 }
  0xa8   :  { %v635_v44 = vadd.f32 %v634_v41, %v633_v39  ;;  %vm185_vm6 = vcmp.eq.s32.totalorder %v117_v36, %v996_v9 }
  0xa9   :  { %v324_v46 = vpop.permute.xlu1 %323  ;;  %v319_v47 = vpop.permute.xlu0 %318  ;;  %vm186_vm7 = vcmp.eq.s32.totalorder %v118_v40, %v996_v9 }
  0xaa   :  { %v637_v49 = vadd.f32 %v636_v45, %v635_v44  ;;  %v556_v50 = vsel %vm172_vm8, %v319_v47, 0.0  ;;  %v557_v53 = vsel %vm173_vm9, %v324_v46, 0.0  ;;  %v119_v46 = vadd.s32 280, %v981_v2 }
  0xab   :  { %v640_v55 = vsel %vm600_vm5, %v556_v50, 0.0  ;;  %v642_v61 = vsel %vm600_vm5, %v557_v53, 0.0  ;;  %v120_v50 = vadd.s32 288, %v981_v2 }
  0xac   :  { %v639_v54 = vadd.f32 %v638_v51, %v637_v49  ;;  %vm187_vm8 = vcmp.eq.s32.totalorder %v119_v46, %v996_v9 }
  0xad   :  { %v334_v56 = vpop.permute.xlu1 %333  ;;  %v329_v57 = vpop.permute.xlu0 %328  ;;  %vm188_vm9 = vcmp.eq.s32.totalorder %v120_v50, %v996_v9 }
  0xae   :  { %v641_v59 = vadd.f32 %v640_v55, %v639_v54  ;;  %v558_v60 = vsel %vm174_vm10, %v329_v57, 0.0  ;;  %v559_v63 = vsel %vm175_vm11, %v334_v56, 0.0  ;;  %v121_v56 = vadd.s32 296, %v981_v2 }
  0xaf   :  { %v644_v1 = vsel %vm600_vm5, %v558_v60, 0.0  ;;  %v646_v8 = vsel %vm600_vm5, %v559_v63, 0.0  ;;  %v122_v60 = vadd.s32 304, %v981_v2 }
  0xb0   :  { %v643_v0 = vadd.f32 %v642_v61, %v641_v59  ;;  %vm189_vm10 = vcmp.eq.s32.totalorder %v121_v56, %v996_v9 }
  0xb1   :  { %v344_v3 = vpop.permute.xlu1 %343  ;;  %v339_v4 = vpop.permute.xlu0 %338  ;;  %vm190_vm11 = vcmp.eq.s32.totalorder %v122_v60, %v996_v9 }
  0xb2   :  { %v645_v6 = vadd.f32 %v644_v1, %v643_v0  ;;  %v560_v7 = vsel %vm176_vm12, %v339_v4, 0.0  ;;  %v561_v11 = vsel %vm177_vm13, %v344_v3, 0.0  ;;  %v123_v3 = vadd.s32 312, %v981_v2 }
  0xb3   :  { %v648_v13 = vsel %vm600_vm5, %v560_v7, 0.0  ;;  %v650_v19 = vsel %vm600_vm5, %v561_v11, 0.0  ;;  %v124_v7 = vadd.s32 320, %v981_v2 }
  0xb4   :  { %v647_v12 = vadd.f32 %v646_v8, %v645_v6  ;;  %vm191_vm12 = vcmp.eq.s32.totalorder %v123_v3, %v996_v9 }
  0xb5   :  { %v354_v14 = vpop.permute.xlu1 %353  ;;  %v349_v15 = vpop.permute.xlu0 %348  ;;  %vm192_vm13 = vcmp.eq.s32.totalorder %v124_v7, %v996_v9 }
  0xb6   :  { %v649_v17 = vadd.f32 %v648_v13, %v647_v12  ;;  %v562_v18 = vsel %vm178_vm14, %v349_v15, 0.0  ;;  %v563_v21 = vsel %vm179_vm15, %v354_v14, 0.0  ;;  %v125_v14 = vadd.s32 328, %v981_v2 }
  0xb7   :  { %v652_v23 = vsel %vm600_vm5, %v562_v18, 0.0  ;;  %v654_v29 = vsel %vm600_vm5, %v563_v21, 0.0  ;;  %v126_v18 = vadd.s32 336, %v981_v2 }
  0xb8   :  { %v651_v22 = vadd.f32 %v650_v19, %v649_v17  ;;  %vm193_vm14 = vcmp.eq.s32.totalorder %v125_v14, %v996_v9 }
  0xb9   :  { %v364_v24 = vpop.permute.xlu1 %363  ;;  %v359_v25 = vpop.permute.xlu0 %358  ;;  %vm194_vm15 = vcmp.eq.s32.totalorder %v126_v18, %v996_v9 }
  0xba   :  { %v653_v27 = vadd.f32 %v652_v23, %v651_v22  ;;  %v564_v28 = vsel %vm180_vm0, %v359_v25, 0.0  ;;  %v565_v31 = vsel %vm181_vm1, %v364_v24, 0.0  ;;  %v127_v24 = vadd.s32 344, %v981_v2 }
  0xbb   :  { %v656_v33 = vsel %vm600_vm5, %v564_v28, 0.0  ;;  %v658_v39 = vsel %vm600_vm5, %v565_v31, 0.0  ;;  %v128_v28 = vadd.s32 352, %v981_v2 }
  0xbc   :  { %v655_v32 = vadd.f32 %v654_v29, %v653_v27  ;;  %vm195_vm0 = vcmp.eq.s32.totalorder %v127_v24, %v996_v9 }
  0xbd   :  { %v374_v34 = vpop.permute.xlu1 %373  ;;  %v369_v35 = vpop.permute.xlu0 %368  ;;  %vm196_vm1 = vcmp.eq.s32.totalorder %v128_v28, %v996_v9 }
  0xbe   :  { %v657_v37 = vadd.f32 %v656_v33, %v655_v32  ;;  %v566_v38 = vsel %vm182_vm2, %v369_v35, 0.0  ;;  %v567_v41 = vsel %vm183_vm3, %v374_v34, 0.0  ;;  %v129_v34 = vadd.s32 360, %v981_v2 }
  0xbf   :  { %v660_v43 = vsel %vm600_vm5, %v566_v38, 0.0  ;;  %v662_v49 = vsel %vm600_vm5, %v567_v41, 0.0  ;;  %v130_v38 = vadd.s32 368, %v981_v2 }
  0xc0   :  { %v659_v42 = vadd.f32 %v658_v39, %v657_v37  ;;  %vm197_vm2 = vcmp.eq.s32.totalorder %v129_v34, %v996_v9 }
  0xc1   :  { %v384_v44 = vpop.permute.xlu1 %383  ;;  %v379_v45 = vpop.permute.xlu0 %378  ;;  %vm198_vm3 = vcmp.eq.s32.totalorder %v130_v38, %v996_v9 }
  0xc2   :  { %v661_v47 = vadd.f32 %v660_v43, %v659_v42  ;;  %v568_v48 = vsel %vm184_vm4, %v379_v45, 0.0  ;;  %v569_v51 = vsel %vm185_vm6, %v384_v44, 0.0  ;;  %v131_v44 = vadd.s32 376, %v981_v2 }
  0xc3   :  { %v664_v53 = vsel %vm600_vm5, %v568_v48, 0.0  ;;  %v666_v59 = vsel %vm600_vm5, %v569_v51, 0.0  ;;  %v132_v48 = vadd.s32 384, %v981_v2 }
  0xc4   :  { %v663_v52 = vadd.f32 %v662_v49, %v661_v47  ;;  %vm199_vm4 = vcmp.eq.s32.totalorder %v131_v44, %v996_v9 }
  0xc5   :  { %v394_v54 = vpop.permute.xlu1 %393  ;;  %v389_v55 = vpop.permute.xlu0 %388  ;;  %vm200_vm6 = vcmp.eq.s32.totalorder %v132_v48, %v996_v9 }
  0xc6   :  { %v665_v57 = vadd.f32 %v664_v53, %v663_v52  ;;  %v570_v58 = vsel %vm186_vm7, %v389_v55, 0.0  ;;  %v571_v61 = vsel %vm187_vm8, %v394_v54, 0.0  ;;  %v133_v54 = vadd.s32 392, %v981_v2 }
  0xc7   :  { %v668_v63 = vsel %vm600_vm5, %v570_v58, 0.0  ;;  %v670_v6 = vsel %vm600_vm5, %v571_v61, 0.0  ;;  %v134_v58 = vadd.s32 400, %v981_v2 }
  0xc8   :  { %v667_v62 = vadd.f32 %v666_v59, %v665_v57  ;;  %vm201_vm7 = vcmp.eq.s32.totalorder %v133_v54, %v996_v9 }
  0xc9   :  { %v404_v0 = vpop.permute.xlu1 %403  ;;  %v399_v1 = vpop.permute.xlu0 %398  ;;  %vm202_vm8 = vcmp.eq.s32.totalorder %v134_v58, %v996_v9 }
  0xca   :  { %v669_v4 = vadd.f32 %v668_v63, %v667_v62  ;;  %v572_v5 = vsel %vm188_vm9, %v399_v1, 0.0  ;;  %v573_v8 = vsel %vm189_vm10, %v404_v0, 0.0  ;;  %v135_v0 = vadd.s32 408, %v981_v2 }
  0xcb   :  { %v672_v11 = vsel %vm600_vm5, %v572_v5, 0.0  ;;  %v674_v17 = vsel %vm600_vm5, %v573_v8, 0.0  ;;  %v136_v5 = vadd.s32 416, %v981_v2 }
  0xcc   :  { %v671_v10 = vadd.f32 %v670_v6, %v669_v4  ;;  %vm203_vm9 = vcmp.eq.s32.totalorder %v135_v0, %v996_v9 }
  0xcd   :  { %v414_v12 = vpop.permute.xlu1 %413  ;;  %v409_v13 = vpop.permute.xlu0 %408  ;;  %vm204_vm10 = vcmp.eq.s32.totalorder %v136_v5, %v996_v9 }
  0xce   :  { %v673_v15 = vadd.f32 %v672_v11, %v671_v10  ;;  %v574_v16 = vsel %vm190_vm11, %v409_v13, 0.0  ;;  %v575_v19 = vsel %vm191_vm12, %v414_v12, 0.0  ;;  %v137_v12 = vadd.s32 424, %v981_v2 }
  0xcf   :  { %v676_v21 = vsel %vm600_vm5, %v574_v16, 0.0  ;;  %v678_v27 = vsel %vm600_vm5, %v575_v19, 0.0  ;;  %v138_v16 = vadd.s32 432, %v981_v2 }
  0xd0   :  { %v675_v20 = vadd.f32 %v674_v17, %v673_v15  ;;  %vm205_vm11 = vcmp.eq.s32.totalorder %v137_v12, %v996_v9 }
  0xd1   :  { %v424_v22 = vpop.permute.xlu1 %423  ;;  %v419_v23 = vpop.permute.xlu0 %418  ;;  %vm206_vm12 = vcmp.eq.s32.totalorder %v138_v16, %v996_v9 }
  0xd2   :  { %v677_v25 = vadd.f32 %v676_v21, %v675_v20  ;;  %v576_v26 = vsel %vm192_vm13, %v419_v23, 0.0  ;;  %v577_v29 = vsel %vm193_vm14, %v424_v22, 0.0  ;;  %v139_v22 = vadd.s32 440, %v981_v2 }
  0xd3   :  { %v680_v31 = vsel %vm600_vm5, %v576_v26, 0.0  ;;  %v682_v37 = vsel %vm600_vm5, %v577_v29, 0.0  ;;  %v140_v26 = vadd.s32 448, %v981_v2 }
  0xd4   :  { %v679_v30 = vadd.f32 %v678_v27, %v677_v25  ;;  %vm207_vm13 = vcmp.eq.s32.totalorder %v139_v22, %v996_v9 }
  0xd5   :  { %v434_v32 = vpop.permute.xlu1 %433  ;;  %v429_v33 = vpop.permute.xlu0 %428  ;;  %vm208_vm14 = vcmp.eq.s32.totalorder %v140_v26, %v996_v9 }
  0xd6   :  { %v681_v35 = vadd.f32 %v680_v31, %v679_v30  ;;  %v578_v36 = vsel %vm194_vm15, %v429_v33, 0.0  ;;  %v579_v39 = vsel %vm195_vm0, %v434_v32, 0.0  ;;  %v141_v32 = vadd.s32 456, %v981_v2 }
  0xd7   :  { %v684_v41 = vsel %vm600_vm5, %v578_v36, 0.0  ;;  %v686_v47 = vsel %vm600_vm5, %v579_v39, 0.0  ;;  %v142_v36 = vadd.s32 464, %v981_v2 }
  0xd8   :  { %v683_v40 = vadd.f32 %v682_v37, %v681_v35  ;;  %vm209_vm15 = vcmp.eq.s32.totalorder %v141_v32, %v996_v9 }
  0xd9   :  { %v444_v42 = vpop.permute.xlu1 %443  ;;  %v439_v43 = vpop.permute.xlu0 %438  ;;  %vm210_vm0 = vcmp.eq.s32.totalorder %v142_v36, %v996_v9 }
  0xda   :  { %v685_v45 = vadd.f32 %v684_v41, %v683_v40  ;;  %v580_v46 = vsel %vm196_vm1, %v439_v43, 0.0  ;;  %v581_v49 = vsel %vm197_vm2, %v444_v42, 0.0  ;;  %v143_v42 = vadd.s32 472, %v981_v2 }
  0xdb   :  { %v688_v51 = vsel %vm600_vm5, %v580_v46, 0.0  ;;  %v690_v57 = vsel %vm600_vm5, %v581_v49, 0.0  ;;  %v144_v46 = vadd.s32 480, %v981_v2 }
  0xdc   :  { %v687_v50 = vadd.f32 %v686_v47, %v685_v45  ;;  %vm211_vm1 = vcmp.eq.s32.totalorder %v143_v42, %v996_v9 }
  0xdd   :  { %v454_v52 = vpop.permute.xlu1 %453  ;;  %v449_v53 = vpop.permute.xlu0 %448  ;;  %vm212_vm2 = vcmp.eq.s32.totalorder %v144_v46, %v996_v9 }
  0xde   :  { %v689_v55 = vadd.f32 %v688_v51, %v687_v50  ;;  %v582_v56 = vsel %vm198_vm3, %v449_v53, 0.0  ;;  %v583_v59 = vsel %vm199_vm4, %v454_v52, 0.0  ;;  %v145_v52 = vadd.s32 488, %v981_v2 }
  0xdf   :  { %v692_v61 = vsel %vm600_vm5, %v582_v56, 0.0  ;;  %v694_v4 = vsel %vm600_vm5, %v583_v59, 0.0  ;;  %v146_v56 = vadd.s32 496, %v981_v2 }
  0xe0   :  { %v691_v60 = vadd.f32 %v690_v57, %v689_v55  ;;  %vm213_vm3 = vcmp.eq.s32.totalorder %v145_v52, %v996_v9 }
  0xe1   :  { %v464_v62 = vpop.permute.xlu1 %463  ;;  %v459_v63 = vpop.permute.xlu0 %458  ;;  %vm214_vm4 = vcmp.eq.s32.totalorder %v146_v56, %v996_v9 }
  0xe2   :  { %v693_v1 = vadd.f32 %v692_v61, %v691_v60  ;;  %v584_v3 = vsel %vm200_vm6, %v459_v63, 0.0  ;;  %v585_v6 = vsel %vm201_vm7, %v464_v62, 0.0  ;;  %v147_v62 = vadd.s32 504, %v981_v2 }
  0xe3   :  { %v696_v8 = vsel %vm600_vm5, %v584_v3, 0.0  ;;  %v698_v15 = vsel %vm600_vm5, %v585_v6, 0.0  ;;  %vm734_vm7 = vcmask 57344  }
  0xe4   :  { %v695_v7 = vadd.f32 %v694_v4, %v693_v1  ;;  %vm215_vm6 = vcmp.eq.s32.totalorder %v147_v62, %v996_v9 }
  0xe5   :  { %v474_v10 = vpop.permute.xlu1 %473  ;;  %v469_v11 = vpop.permute.xlu0 %468 }
  0xe6   :  { %v697_v13 = vadd.f32 %v696_v8, %v695_v7  ;;  %v586_v14 = vsel %vm202_vm8, %v469_v11, 0.0  ;;  %v587_v17 = vsel %vm203_vm9, %v474_v10, 0.0 }
  0xe7   :  { %v700_v19 = vsel %vm600_vm5, %v586_v14, 0.0  ;;  %v702_v25 = vsel %vm600_vm5, %v587_v17, 0.0 }
  0xe8   :  { %v699_v18 = vadd.f32 %v698_v15, %v697_v13 }
  0xe9   :  { %v484_v20 = vpop.permute.xlu1 %483  ;;  %v479_v21 = vpop.permute.xlu0 %478 }
  0xea   :  { %v701_v23 = vadd.f32 %v700_v19, %v699_v18  ;;  %v588_v24 = vsel %vm204_vm10, %v479_v21, 0.0  ;;  %v589_v27 = vsel %vm205_vm11, %v484_v20, 0.0 }
  0xeb   :  { %v704_v29 = vsel %vm600_vm5, %v588_v24, 0.0  ;;  %v706_v35 = vsel %vm600_vm5, %v589_v27, 0.0 }
  0xec   :  { %v703_v28 = vadd.f32 %v702_v25, %v701_v23 }
  0xed   :  { %v494_v30 = vpop.permute.xlu1 %493  ;;  %v489_v31 = vpop.permute.xlu0 %488 }
  0xee   :  { %v705_v33 = vadd.f32 %v704_v29, %v703_v28  ;;  %v590_v34 = vsel %vm206_vm12, %v489_v31, 0.0  ;;  %v591_v37 = vsel %vm207_vm13, %v494_v30, 0.0 }
  0xef   :  { %v708_v39 = vsel %vm600_vm5, %v590_v34, 0.0  ;;  %v710_v45 = vsel %vm600_vm5, %v591_v37, 0.0 }
  0xf0   :  { %v707_v38 = vadd.f32 %v706_v35, %v705_v33 }
  0xf1   :  { %v504_v40 = vpop.permute.xlu1 %503  ;;  %v499_v41 = vpop.permute.xlu0 %498 }
  0xf2   :  { %v709_v43 = vadd.f32 %v708_v39, %v707_v38  ;;  %v592_v44 = vsel %vm208_vm14, %v499_v41, 0.0  ;;  %v593_v47 = vsel %vm209_vm15, %v504_v40, 0.0 }
  0xf3   :  { %v712_v49 = vsel %vm600_vm5, %v592_v44, 0.0  ;;  %v714_v55 = vsel %vm600_vm5, %v593_v47, 0.0 }
  0xf4   :  { %v711_v48 = vadd.f32 %v710_v45, %v709_v43 }
  0xf5   :  { %v514_v50 = vpop.permute.xlu1 %513  ;;  %v509_v51 = vpop.permute.xlu0 %508 }
  0xf6   :  { %v713_v53 = vadd.f32 %v712_v49, %v711_v48  ;;  %v594_v54 = vsel %vm210_vm0, %v509_v51, 0.0  ;;  %v595_v57 = vsel %vm211_vm1, %v514_v50, 0.0 }
  0xf7   :  { %v716_v59 = vsel %vm600_vm5, %v594_v54, 0.0  ;;  %v718_v1 = vsel %vm600_vm5, %v595_v57, 0.0 }
  0xf8   :  { %v715_v58 = vadd.f32 %v714_v55, %v713_v53 }
  0xf9   :  { %v524_v60 = vpop.permute.xlu1 %523  ;;  %v519_v61 = vpop.permute.xlu0 %518 }
  0xfa   :  { %v717_v63 = vadd.f32 %v716_v59, %v715_v58  ;;  %v596_v0 = vsel %vm212_vm2, %v519_v61, 0.0  ;;  %v597_v3 = vsel %vm213_vm3, %v524_v60, 0.0 }
  0xfb   :  { %v720_v5 = vsel %vm600_vm5, %v596_v0, 0.0  ;;  %v722_v11 = vsel %vm600_vm5, %v597_v3, 0.0 }
  0xfc   :  { %v719_v4 = vadd.f32 %v718_v1, %v717_v63 }
  0xfd   :  { %v534_v6 = vpop.permute.xlu1 %533  ;;  %v529_v7 = vpop.permute.xlu0 %528 }
  0xfe   :  { %v721_v8 = vadd.f32 %v720_v5, %v719_v4  ;;  %v598_v10 = vsel %vm214_vm4, %v529_v7, 0.0  ;;  %v599_v12 = vsel %vm215_vm6, %v534_v6, 0.0 }
  0xff   :  { %v724_v13 = vsel %vm600_vm5, %v598_v10, 0.0  ;;  %v726_v15 = vsel %vm600_vm5, %v599_v12, 0.0 }
 0x100   :  { %v723_v2 = vadd.f32 %v722_v11, %v721_v8 }
 0x102   :  { %v725_v14 = vadd.f32 %v724_v13, %v723_v2 }
 0x104   :  { %v727_v16 = vadd.f32 %v726_v15, %v725_v14 }
 0x106   :  { %v728_v17 = vrot.slane %v727_v16, 4 }
 0x108   :  { %v729_v18 = vadd.f32 %v728_v17, %v727_v16 }
 0x10a   :  { %v730_v19 = vrot.slane %v729_v18, 2 }
 0x10c   :  { %v731_v20 = vadd.f32 %v730_v19, %v729_v18 }
 0x10e   :  { %v732_v9 = vrot.slane %v731_v20, 1 }
 0x110   :  { %v733_v21 = vadd.f32 %v732_v9, %v731_v20 }
 0x112   :  { %735 = vst.msk [vmem:[#allocation2] sm:$0x1] %vm734_vm7, %v733_v21 }
 0x113   :  { %768 = shalt.err (!%p765_p4)
}
 0x114   :  { %s769_s3 = scalar_lea.hbm %s1204_s2, 16 }
 0x115   :  { %p770_p5 = scmp.ne.s32.totalorder %s1204_s2, %s769_s3  ;;  %p773_p6 = scmp.lt.u32.totalorder %s769_s3, %s1204_s2 }
 0x117   :  { %p775_p7 = pnand %p773_p6, %p770_p5 }
 0x119   :  { %778 = shalt.err (!%p775_p7)
}
 0x11a   :  { %745 = dma.vmem_to_hbm [thread:$0]  %s743_s26, 16, %s1204_s2, [#allocation3]  }
 0x11b   :  { %779 = dma.done.wait [#allocation3], 16  }
 0x11c   :  { %780 = vsyncadd [#allocation3], 4294967280 }
 0x11d   :  { %749 = vsyncpa [#allocation3], 1 }

</bundles_post_ra>
